<compile_context>
chip_gen: v5e
topology: v5e:2x2
jax: 0.10.0
libtpu: 0.0.40
codegen_flags: <defaults>
</compile_context>

<pallas_src>
import math

import numpy as np
import jax
import jax.numpy as jnp
from jax.experimental import pallas as pl
from jax.experimental.pallas import tpu as pltpu


def synthesis_input_kernel(t_ref, f2pi_ref, mod_ref, o_ref):
    # t_ref:    (1, L)           L = TILE_R*2R; lane p = r*2R + j carries t[r]
    # f2pi_ref: (half, L)        2*pi*freq per (freq-channel, lane), lane-tiled, grid-invariant
    # mod_ref:  (1, 2, half, L)  styles*weight/sqrt(C), lane-tiled; [:,0]=sin half, [:,1]=cos half
    # o_ref:    (1, 2, half, L)  module layout after a free reshape to (N, C, res, 2R)
    phase = t_ref[...] * f2pi_ref[...]                         # (half, L), computed once
    o_ref[0, 0] = (jnp.sin(phase) * mod_ref[0, 0]).astype(o_ref.dtype)
    o_ref[0, 1] = (jnp.cos(phase) * mod_ref[0, 1]).astype(o_ref.dtype)


def init_synthesis_input_params(key, channels, w_dim, resolution, rank=8, bandwidth=10.0):
    assert channels % 2 == 0, "SynthesisInput requires an even channel count"
    k_f, k_w, k_a = jax.random.split(key, 3)
    half = channels // 2
    feat = channels * 2 * rank
    freqs = jax.random.normal(k_f, (1, half * rank), jnp.float32) * bandwidth
    coords = jnp.tile(
        jnp.linspace(0.0, 1.0, resolution, dtype=jnp.float32).reshape(1, resolution, 1, 1),
        (1, 1, 2, 1))
    return {
        "freqs": freqs,                                                  # buffer (1, C/2*R)
        "coords": coords,                                                # buffer (1, res, 2, 1)
        "weight": jax.random.normal(k_w, (1, channels, 1, 2 * rank), jnp.float32),
        # FullyConnectedLayer(w_dim, C*2R, bias_init=1): weight ~ randn, bias = 1
        "affine_weight": jax.random.normal(k_a, (feat, w_dim), jnp.float32),
        "affine_bias": jnp.ones((feat,), jnp.float32),
    }


def _pick_spatial_tile(res, channels, two_r, itemsize=4,
                       target_bytes=4 * 1024 * 1024, min_steps=1):
    """Pick TILE_R dividing res with a lane-dense block (TILE_R*2R % 128 == 0) of <= target bytes."""
    def block_bytes(tile):
        return channels * tile * two_r * itemsize

    divisors = [d for d in range(1, res + 1) if res % d == 0]
    lane_ok = [d for d in divisors if (d * two_r) % 128 == 0]
    # Preference order: lane-dense AND under the byte cap AND enough grid steps -> largest.
    good = [d for d in lane_ok if block_bytes(d) <= target_bytes and res // d >= min_steps]
    if good:
        return max(good)
    good = [d for d in lane_ok if block_bytes(d) <= target_bytes]
    if good:
        return max(good)
    if lane_ok:
        return min(lane_ok)   # smallest lane-dense tile (above the cap, but never blows up to res)
    # Last resort: full spatial extent (legal because it equals the array dim; may mask stores).
    return res


def synthesis_input_forward(w, params, channels, rank, out_dtype=jnp.float32):
    N, w_dim = w.shape
    C, R = channels, rank
    half = C // 2
    two_r = 2 * R
    res = params["coords"].shape[1]

    # ---------------- wrapper-side prep: O(F) / O(N*F) work ----------------
    # Style affine hoisted out of the kernel: ONE dense (N, w_dim) @ (w_dim, C*2R) matmul.
    styles = (jnp.dot(w, (params["affine_weight"] * (1.0 / math.sqrt(w_dim))).T,
                      precision=jax.lax.Precision.HIGHEST)
              + params["affine_bias"][None, :]).astype(jnp.float32)            # (N, C*2R)
    # Fold weight and 1/sqrt(C) into the styles -> a single per-element multiply in-kernel.
    mod = (styles.reshape(N, C, two_r)
           * params["weight"].reshape(1, C, two_r)
           * (1.0 / math.sqrt(C))).reshape(N, 2, half, two_r)                  # [:,0]=sin, [:,1]=cos

    # Frequencies duplicated over the 2 coordinate slots: fvec[c, j] = freqs[c, j mod R].
    fr = params["freqs"].reshape(half, R)
    f2pi = (2.0 * np.pi) * jnp.tile(fr, (1, 2))                                # (half, 2R)

    # Normalized coords (the registered 'coords' buffer), expanded over the j axis.
    t = params["coords"][0, :, 0, 0]                                           # (res,)
    t_exp = jnp.repeat(t, two_r).reshape(1, res * two_r)                       # lane p=r*2R+j -> t[r]

    TILE_R = _pick_spatial_tile(res, C, two_r,
                                itemsize=np.dtype(out_dtype).itemsize,
                                min_steps=2 if N == 1 else 1)
    L = TILE_R * two_r
    grid = (N, res // TILE_R)     # batch slow, spatial fast: mod block resident across spatial steps

    # Lane-tile the per-feature constants over the spatial positions inside one block.
    f2pi_tiled = jnp.tile(f2pi, (1, TILE_R))                                   # (half, L)
    mod_tiled = jnp.tile(mod, (1, 1, 1, TILE_R))                               # (N, 2, half, L)

    out = pl.pallas_call(
        synthesis_input_kernel,
        out_shape=jax.ShapeDtypeStruct((N, 2, half, res * two_r), out_dtype),
        grid_spec=pltpu.PrefetchScalarGridSpec(
            num_scalar_prefetch=0,
            grid=grid,
            in_specs=[
                pl.BlockSpec((1, L), lambda n, r: (0, r)),                 # coords tile (lane-dense)
                pl.BlockSpec((half, L), lambda n, r: (0, 0)),              # 2*pi*freq (grid-invariant)
                pl.BlockSpec((1, 2, half, L), lambda n, r: (n, 0, 0, 0)),  # modulation for batch n
            ],
            out_specs=pl.BlockSpec((1, 2, half, L), lambda n, r: (n, 0, 0, r)),
        ),
        compiler_params=pltpu.CompilerParams(
            dimension_semantics=("parallel", "parallel"),
            vmem_limit_bytes=40 * 1024 * 1024,
        ),
    )(t_exp, f2pi_tiled, mod_tiled)

    # (N, 2, C/2, res*2R) -> (N, C, res, 2R): pure row-major reshape (no transpose, no extra HBM pass)
    return out.reshape(N, C, res, two_r)


def synthesis_input_reference(w, params, channels, rank):
    """Direct JAX transcription of SynthesisInput.forward (PyTorch)."""
    freqs = params["freqs"]                       # (1, C/2*R)
    coords = params["coords"]                     # (1, res, 2, 1)
    weight = params["weight"]                     # (1, C, 1, 2R)
    aff_w = params["affine_weight"]               # (C*2R, w_dim)
    aff_b = params["affine_bias"]                 # (C*2R,)
    N = w.shape[0]
    res = coords.shape[1]
    w_dim = aff_w.shape[1]

    x = jnp.matmul(jnp.broadcast_to(coords, (N, res, 2, 1)), freqs,
                   precision=jax.lax.Precision.HIGHEST)                 # (N, res, 2, C/2*R)
    x = x.reshape(N, res, 2, channels // 2, rank)
    x = jnp.transpose(x, (0, 3, 1, 2, 4)) * (np.pi * 2)
    x = x.reshape(N, channels // 2, res, 2 * rank)
    x = jnp.concatenate([x, x + np.pi / 2], axis=1)
    x = jnp.sin(x)
    styles = jnp.dot(w, (aff_w * (1.0 / math.sqrt(w_dim))).T,
                     precision=jax.lax.Precision.HIGHEST) + aff_b
    wmod = weight * styles.reshape(N, channels, 1, 2 * rank)
    return x * wmod / math.sqrt(channels)


if __name__ == "__main__":
    # Small shapes consistent with the module's forward.
    N, channels, w_dim, resolution, rank = 2, 4, 32, 16, 8

    key = jax.random.PRNGKey(0)
    k_params, k_w = jax.random.split(key)

    params = init_synthesis_input_params(k_params, channels, w_dim, resolution,
                                         rank=rank, bandwidth=10.0)
    w = jax.random.normal(k_w, (N, w_dim), jnp.float32)

    y = jax.block_until_ready(synthesis_input_forward(w, params, channels, rank))
    y_ref = jax.block_until_ready(synthesis_input_reference(w, params, channels, rank))

    assert y.shape == (N, channels, resolution, 2 * rank)
    np.testing.assert_allclose(np.asarray(y), np.asarray(y_ref), rtol=1e-2, atol=1e-2)

    print("KERNEL_OK")
</pallas_src>

<mosaic_0001>
module attributes {stable_mosaic.version = 11 : i64} {
  func.func @synthesis_input_kernel(%arg0: i32, %arg1: i32, %arg2: memref<1x256xf32, #tpu.memory_space<vmem>>, %arg3: memref<2x256xf32, #tpu.memory_space<vmem>>, %arg4: memref<1x2x2x256xf32, #tpu.memory_space<vmem>>, %arg5: memref<1x2x2x256xf32, #tpu.memory_space<vmem>>) attributes {dimension_semantics = [#tpu.dimension_semantics<parallel>, #tpu.dimension_semantics<parallel>], iteration_bounds = array<i64: 2, 1>, scalar_prefetch = 0 : i64, scratch_operands = 0 : i64, tpu.core_type = #tpu.core_type<tc>, window_params = [{transform_indices = @transform_0, window_bounds = array<i64: 1, 256>}, {pipeline_mode = #tpu.pipeline_mode<synchronous>, transform_indices = @transform_1, window_bounds = array<i64: 2, 256>}, {transform_indices = @transform_2, window_bounds = array<i64: 1, 2, 2, 256>}, {transform_indices = @transform_3, window_bounds = array<i64: 1, 2, 2, 256>}]} {
    %c0 = arith.constant 0 : index
    %c0_0 = arith.constant 0 : index
    %0 = vector.load %arg2[%c0, %c0_0] : memref<1x256xf32, #tpu.memory_space<vmem>>, vector<1x256xf32>
    %c0_1 = arith.constant 0 : index
    %c0_2 = arith.constant 0 : index
    %1 = vector.load %arg3[%c0_1, %c0_2] : memref<2x256xf32, #tpu.memory_space<vmem>>, vector<2x256xf32>
    %2 = vector.broadcast %0 : vector<1x256xf32> to vector<2x256xf32>
    %3 = arith.mulf %2, %1 : vector<2x256xf32>
    %4 = math.sin %3 : vector<2x256xf32>
    %c0_3 = arith.constant 0 : index
    %c0_4 = arith.constant 0 : index
    %c0_5 = arith.constant 0 : index
    %c0_6 = arith.constant 0 : index
    %5 = vector.load %arg4[%c0_3, %c0_4, %c0_5, %c0_6] : memref<1x2x2x256xf32, #tpu.memory_space<vmem>>, vector<1x1x2x256xf32>
    %6 = vector.shape_cast %5 : vector<1x1x2x256xf32> to vector<2x256xf32>
    %7 = arith.mulf %4, %6 : vector<2x256xf32>
    %c0_7 = arith.constant 0 : index
    %c0_8 = arith.constant 0 : index
    %c0_9 = arith.constant 0 : index
    %c0_10 = arith.constant 0 : index
    %8 = vector.load %arg5[%c0_7, %c0_8, %c0_9, %c0_10] : memref<1x2x2x256xf32, #tpu.memory_space<vmem>>, vector<1x1x2x256xf32>
    %9 = vector.shape_cast %8 : vector<1x1x2x256xf32> to vector<2x256xf32>
    %10 = vector.shape_cast %7 : vector<2x256xf32> to vector<1x1x2x256xf32>
    tpu.vector_store %arg5[%c0_7, %c0_8, %c0_9, %c0_10], %10 {strides = array<i32>} : memref<1x2x2x256xf32, #tpu.memory_space<vmem>>, vector<1x1x2x256xf32>,
    %11 = math.cos %3 : vector<2x256xf32>
    %c0_11 = arith.constant 0 : index
    %c1 = arith.constant 1 : index
    %c0_12 = arith.constant 0 : index
    %c0_13 = arith.constant 0 : index
    %12 = vector.load %arg4[%c0_11, %c1, %c0_12, %c0_13] : memref<1x2x2x256xf32, #tpu.memory_space<vmem>>, vector<1x1x2x256xf32>
    %13 = vector.shape_cast %12 : vector<1x1x2x256xf32> to vector<2x256xf32>
    %14 = arith.mulf %11, %13 : vector<2x256xf32>
    %c0_14 = arith.constant 0 : index
    %c1_15 = arith.constant 1 : index
    %c0_16 = arith.constant 0 : index
    %c0_17 = arith.constant 0 : index
    %15 = vector.load %arg5[%c0_14, %c1_15, %c0_16, %c0_17] : memref<1x2x2x256xf32, #tpu.memory_space<vmem>>, vector<1x1x2x256xf32>
    %16 = vector.shape_cast %15 : vector<1x1x2x256xf32> to vector<2x256xf32>
    %17 = vector.shape_cast %14 : vector<2x256xf32> to vector<1x1x2x256xf32>
    tpu.vector_store %arg5[%c0_14, %c1_15, %c0_16, %c0_17], %17 {strides = array<i32>} : memref<1x2x2x256xf32, #tpu.memory_space<vmem>>, vector<1x1x2x256xf32>,
    return
  }
  func.func @transform_0(%arg0: i32, %arg1: i32) -> (i32, i32) {
    %c0_i32 = arith.constant 0 : i32
    %c0_i32_0 = arith.constant 0 : i32
    return %c0_i32, %arg1 : i32, i32
  }
  func.func @transform_1(%arg0: i32, %arg1: i32) -> (i32, i32) {
    %c0_i32 = arith.constant 0 : i32
    %c0_i32_0 = arith.constant 0 : i32
    %c0_i32_1 = arith.constant 0 : i32
    return %c0_i32, %c0_i32_0 : i32, i32
  }
  func.func @transform_2(%arg0: i32, %arg1: i32) -> (i32, i32, i32, i32) {
    %c0_i32 = arith.constant 0 : i32
    %c0_i32_0 = arith.constant 0 : i32
    %c0_i32_1 = arith.constant 0 : i32
    %c0_i32_2 = arith.constant 0 : i32
    return %arg0, %c0_i32, %c0_i32_0, %c0_i32_1 : i32, i32, i32, i32
  }
  func.func @transform_3(%arg0: i32, %arg1: i32) -> (i32, i32, i32, i32) {
    %c0_i32 = arith.constant 0 : i32
    %c0_i32_0 = arith.constant 0 : i32
    %c0_i32_1 = arith.constant 0 : i32
    return %arg0, %c0_i32, %c0_i32_0, %arg1 : i32, i32, i32, i32
  }
}

</mosaic_0001>

<bundles_post_ra>
// kernel: tpu_custom_call.1
= control target key start
LH: loop header
LB: loop body
LE: loop exit
PB: predicated region body
PF: predicated region fallthrough
CT: control target
= control target key end

     0   :  { %s1726_s0 = inlined_call_operand.hbm [shape: f32[1,256], index: 0, kind: input, shape index: {}]   ;;  %s1727_s1 = inlined_call_operand.hbm [shape: f32[2,256], index: 1, kind: input, shape index: {}]   ;;  %s1728_s2 = inlined_call_operand.hbm [shape: f32[2,2,2,256], index: 2, kind: input, shape index: {}]   ;;  %s1729_s3 = inlined_call_operand.hbm [shape: f32[2,2,2,256], index: 3, kind: output, shape index: {}]  }
   0x1   :  { %1730 = sst [smem:[#allocation13_spill]] %s1726_s0 }
   0x2   :  { %8 = vsyncpa [#allocation3], 0 }
   0x3   :  { %9 = vsyncpa [#allocation6], 0 }
   0x4   :  { %10 = vsyncpa [#allocation4], 0 }
   0x5   :  { %12 = vsyncpa [#allocation4 + $0x1], 0  ;;  %s1374_s12 = smov 0   ;;  %s1376_s13 = smov 0  }
   0x6   :  { %s1378_s14 = smov 0   ;;  %s1380_s15 = smov 0  }
   0x7   :  { %s1382_s16 = smov 0   ;;  %s1384_s17 = smov 0  }
   0x8 LB: > { %s1405_s18 = sadd.s32 4294967295, %s1339_s17   ;;  %s1031_s19 = sadd.s32 4294967294, %s1339_s17   ;;  %s1339_s17 = sphi %s1384_s17, %s18_s17   ;;  %s1335_s16 = sphi %s1382_s16, %s1746_s16   ;;  %s1331_s15 = sphi %s1380_s15, %s1745_s15   ;;  %s1327_s14 = sphi %s1378_s14, %s1744_s14   ;;  %s1323_s13 = sphi %s1376_s13, %s1743_s13   ;;  %s1319_s12 = sphi %s1374_s12, %s1742_s12  }
   0x9   : > { %s84_s20 = sadd.s32 1, %s1327_s14  ;;  %p91_p0 = scmp.ne.s32.totalorder %s1327_s14, %s1323_s13 }
   0xa   : > { %p92_p1 = scmp.eq.s32.totalorder %s1339_s17, 0  ;;  %p97_p2 = scmp.ne.s32.totalorder %s1323_s13, %s1319_s12 }
   0xb   : > { %p98_p3 = scmp.eq.s32.totalorder %s1405_s18, 0  ;;  %p123_p4 = scmp.eq.s32.totalorder %s1405_s18, 1 }
   0xc   : > { %p1416_p5 = por %p92_p1, %p91_p0  ;;  %p129_p6 = scmp.eq.s32.totalorder %s1031_s19, 1 }
   0xd   : > { %p1422_p7 = por %p98_p3, %p97_p2  ;;  %p1426_p8 = por %p123_p4, %p91_p0 }
   0xe   : > { %p1430_p9 = por %p129_p6, %p97_p2  ;;  %p1032_p10 = scmp.ge.s32.totalorder %s1339_s17, 1 }
   0xf   : > { %p136_p11 = scmp.lt.s32.totalorder %s1339_s17, 3  ;;  %s1735_s0 = sld [smem:[#allocation13_spill]] }
  0x10   : > { %s1341_s29 = smov [#allocation2]   ;;  %p1035_p13 = scmp.ge.s32.totalorder %s1339_s17, 2 }
  0x11   : > { %p1439_p12 = pnand %p1032_p10, %p136_p11  ;;  %s152_s30 = sshll.u32 %s1341_s29, 4  ;;  %s153_s30 = int_to_ptr.vmem [resolvable:$true] %s152_s30 }
  0x12   : > { %p1094_p1 = scmp.lt.s32.totalorder %s1339_s17, 2  ;;  %s162_s6 = sshll.u32 %s1727_s1, 4  ;;  %s163_s6 = int_to_ptr.hbm [resolvable:$true] %s162_s6 }
  0x13   : > { %p1077_p0 = pneg %p1439_p12  ;;  %s1342_s8 = smov [#allocation5]  }
  0x14   : > { %p1454_p4 = pnand %p1094_p1, %p1416_p5  ;;  %s164_s9 = sshll.u32 %s1342_s8, 4  ;;  %s165_s9 = int_to_ptr.vmem [resolvable:$true] %s164_s9 }
  0x15   : > { %s150_s27 = sshll.u32 %s1735_s0, 4  ;;  %p1078_p2 = pnand %p1077_p0, %p98_p3  ;;  %s151_s27 = int_to_ptr.hbm [resolvable:$true] %s150_s27 }
  0x16   : > { %s175_s10 = sand.u32 1, %s1339_s17   ;;  %s30_s11 = sadd.s32 1, %s1335_s16 }
  0x17   : > { %1080 = dma.hbm_to_vmem [thread:$0]  (!%p1078_p2), %s151_s27, 32, %s153_s30, [#allocation3]  }
  0x18   : > { %1083 = dma.hbm_to_vmem [thread:$0]  (!%p1078_p2), %s163_s6, 64, %s165_s9, [#allocation6]  }
  0x19   : > { %s177_s19 = sand.u32 1, %s1327_s14   ;;  %p32_p6 = scmp.ge.s32.totalorder %s30_s11, 2 }
  0x1a   : > { %s1036_s25 = sshll.u32 %s177_s19, 3  ;;  %s1063_s26 = sshll.u32 %s1335_s16, 3 }
  0x1b   : > { %s1748_s11 = smov (%p32_p6, %s30_s11), 0  ;;  %s184_s4 = scalar_lea.hbm %s1728_s2, %s1063_s26 }
  0x1c   : > { %s179_s5 = scalar_lea.vmem [#allocation7], %s1036_s25  ;;  %s81_s30 = ssub.s32 %s1335_s16, %s1748_s11 }
  0x1d   : > { %s187_s27 = sshll.u32 %s179_s5, 4  ;;  %s185_s6 = sshll.u32 %s184_s4, 4  ;;  %s186_s6 = int_to_ptr.hbm [resolvable:$true] %s185_s6  ;;  %s188_s27 = int_to_ptr.vmem [resolvable:$true] %s187_s27 }
  0x1e   : > { %p82_p5 = scmp.eq.s32.totalorder %s81_s30, 0  ;;  %s176_s9 = scalar_lea.sflag [#allocation3], %s175_s10 }
  0x1f   : > { %s1343_s19 = smov 64   ;;  %s1344_s0 = smov 4  }
  0x20   : > { %s1472_s8 = scalar_select %p82_p5, %s1327_s14, %s84_s20  }
  0x21   : > { %1087 = dma.hbm_to_vmem [thread:$0]  (!%p1454_p4), %s186_s6, 128, %s188_s27, %s176_s9, %s1343_s19, %s1343_s19, %s1344_s0  }
  0x22   : > { %199 = sbr.rel (%p1439_p12) target bundleno = 181 (0xb5), region = 32 }
  0x27   : > { %1302 = dma.done.wait (%p98_p3), [#allocation3], 32  }
  0x28   : > { %1304 = vsyncadd (%p98_p3), [#allocation3], 4294967264 }
  0x29   : > { %1306 = dma.done.wait (%p98_p3), [#allocation6], 64  }
  0x2a   : > { %1308 = vsyncadd (%p98_p3), [#allocation6], 4294967232  ;;  %s211_s0 = sand.u32 1, %s1405_s18   ;;  %s213_s20 = sand.u32 1, %s1323_s13  }
  0x2b   : > { %s1490_s28 = sshll.u32 %s213_s20, 3  ;;  %s212_s7 = scalar_lea.sflag [#allocation3], %s211_s0 }
  0x2c   : > { %s215_s10 = scalar_lea.vmem [#allocation7], %s1490_s28 }
  0x2d   : > { %1310 = dma.done.wait (%p1422_p7), %s212_s7, 128  }
  0x2e   : > { %1312 = vsyncadd (%p1422_p7), %s212_s7, 4294967168  ;;  %v242_v0 = vld [vmem:[#allocation5] sm:$0xf]  ;;  %v241_v1 = vld [vmem:[#allocation2] sm:$0x3]  ;;  %s1064_s18 = sshll.u32 %s1331_s15, 3 }
  0x2f   : > { %249 = vst [vmem:[#allocation1] ss:$4 sm:$0xff] %v242_v0  ;;  %v244_v2 = vperm.slane %v241_v1, 0  ;;  %v245_v3 = vperm.slane %v241_v1, 1  ;;  %v566_v4 = vld [vmem:[%s215_s10] sm:$0xf]  ;;  %s921_s15 = scalar_lea.hbm %s1729_s3, %s1064_s18 }
  0x30   : > { %v1056_v15 = vld [vmem:[%s215_s10 + $0x4] sm:$0xf]  ;;  %v1345_v33 = vmov 2102212464   ;;  %v1346_v38 = vmov 920167782  }
  0x31   : > { %v1347_v41 = vmov 1326507024   ;;  %v1348_v45 = vmov 683565275   ;;  %v1349_v47 = vmov 2475754826  }
  0x32   : > { %v1350_v52 = vmov 2131351028   ;;  %s238_s26 = scalar_lea.vmem [#allocation8], %s1490_s28  ;;  %s924_s29 = sshll.u32 %s921_s15, 4  ;;  %s925_s29 = int_to_ptr.hbm [resolvable:$true] %s924_s29 }
  0x33   : > { %s922_s21 = sshll.u32 %s238_s26, 4  ;;  %s908_s4 = scalar_lea.sflag [#allocation4], %s213_s20  ;;  %s923_s21 = int_to_ptr.vmem [resolvable:$true] %s922_s21 }
  0x34   : > { %s1263_s5 = sshra.s32 %s925_s29, 4  ;;  %s1269_s9 = scalar_lea.hbm %s1729_s3, 16  ;;  %s1264_s5 = int_to_ptr.hbm [resolvable:$true] %s1263_s5 }
  0x35   : > { %s1265_s27 = scalar_lea.hbm %s1264_s5, 8  ;;  %p1270_p11 = scmp.lt.s32.totalorder %s1264_s5, %s1729_s3 }
  0x36   : > { %v250_v5 = vld.sshfl [vmem:[#allocation1] sm:$0xff pattern:$0x73625140]  ;;  %v251_v6 = vld.sshfl [vmem:[#allocation1 + $0x8] sm:$0xff pattern:$0x73625140]  ;;  %p1266_p3 = scmp.ne.s32.totalorder %s1264_s5, %s1265_s27  ;;  %p1271_p12 = scmp.lt.s32.totalorder %s1269_s9, %s1265_s27 }
  0x37   : > { %v1497_v7 = vmul.f32 %v250_v5, %v244_v2  ;;  %v1499_v8 = vmul.f32 %v251_v6, %v245_v3  ;;  %568 = vst [vmem:[#allocation1] ss:$4 sm:$0xff] %v566_v4 }
  0x38   : > { %p1267_p7 = pnand %p1266_p3, %p1426_p8  ;;  %p1272_p0 = por %p1271_p12, %p1270_p11 }
  0x39   : > { %v259_v9 = vand.u32 2139095040, %v1497_v7  ;;  %v414_v10 = vand.u32 2139095040, %v1499_v8  ;;  %v256_v11 = vand.u32 2147483647, %v1497_v7  ;;  %v411_v19 = vand.u32 2147483647, %v1499_v8 }
  0x3a   : > { %p1268_p10 = pneg %p1267_p7 }
  0x3b   : > { %v260_v12 = vshrl.u32 %v259_v9, 23  ;;  %v415_v13 = vshrl.u32 %v414_v10, 23  ;;  %v263_v14 = vand.u32 8388607, %v256_v11  ;;  %v418_v24 = vand.u32 8388607, %v411_v19 }
  0x3c   : > { %p1273_p1 = pnand %p1272_p0, %p1268_p10 }
  0x3d   : > { %v1044_v16 = vadd.s32 4294967169, %v260_v12  ;;  %v1047_v17 = vadd.s32 4294967169, %v415_v13  ;;  %v264_v18 = vor.u32 8388608, %v263_v14  ;;  %v419_v32 = vor.u32 8388608, %v418_v24 }
  0x3e   : > { %v1507_v20 = vld.sshfl [vmem:[#allocation1] sm:$0xff pattern:$0x73625140]  ;;  %v1509_v21 = vld.sshfl [vmem:[#allocation1 + $0x8] sm:$0xff pattern:$0x73625140] }
  0x3f   : > { %v266_v22 = vadd.s32 1, %v1044_v16  ;;  %v421_v23 = vadd.s32 1, %v1047_v17  ;;  %893 = vst [vmem:[#allocation1] ss:$4 sm:$0xff] %v1056_v15  ;;  %v1513_v27 = vshll.u32 %v264_v18, 8  ;;  %v1544_v0 = vshll.u32 %v419_v32, 8 }
  0x41   : > { %vm267_vm0 = vcmp.gt.s32.totalorder %v266_v22, 0  ;;  %vm422_vm1 = vcmp.gt.s32.totalorder %v421_v23, 0  ;;  %v305_v36 = vand.u32 65535, %v1513_v27  ;;  %v1525_v37 = vshrl.u32 %v1513_v27, 16 }
  0x42   : > { %v268_v25 = vsel %vm267_vm0, %v266_v22, 0  ;;  %v423_v26 = vsel %vm422_vm1, %v421_v23, 0 }
  0x43   : > { %v1515_v28 = vshrl.u32 %v268_v25, 5  ;;  %v270_v29 = vand.u32 31, %v268_v25  ;;  %v1517_v30 = vand.u32 31, %v423_v26  ;;  %v1541_v62 = vshrl.u32 %v423_v26, 5 }
  0x45   : > { %v271_v31 = vsub.s32 32, %v270_v29  ;;  %v282_v34 = vshll.u32 %v1345_v33, %v270_v29  ;;  %v1521_v35 = vsub.s32 32, %v1517_v30  ;;  %v285_v40 = vshll.u32 %v1346_v38, %v270_v29 }
  0x46   : > { %vm291_vm2 = vcmp.lt.s32.totalorder %v1515_v28, 4  ;;  %v273_v46 = vshll.u32 %v1348_v45, %v270_v29  ;;  %v276_v51 = vshll.u32 %v1349_v47, %v270_v29  ;;  %v437_v54 = vshll.u32 %v1345_v33, %v1517_v30 }
  0x47   : > { %v283_v39 = vshrl.u32 %v1346_v38, %v271_v31  ;;  %v286_v42 = vshrl.u32 %v1347_v41, %v271_v31  ;;  %v438_v43 = vshrl.u32 %v1346_v38, %v1521_v35  ;;  %v441_v44 = vshrl.u32 %v1347_v41, %v1521_v35 }
  0x48   : > { %v274_v48 = vshrl.u32 %v1349_v47, %v271_v31  ;;  %v277_v53 = vshrl.u32 %v1350_v52, %v271_v31  ;;  %v279_v56 = vshll.u32 %v1350_v52, %v270_v29  ;;  %v280_v57 = vshrl.u32 %v1345_v33, %v271_v31 }
  0x49   : > { %v284_v49 = vor.u32 %v283_v39, %v282_v34  ;;  %v287_v50 = vor.u32 %v286_v42, %v285_v40  ;;  %v440_v60 = vshll.u32 %v1346_v38, %v1517_v30  ;;  %vm288_vm3 = vcmp.lt.s32.totalorder %v1515_v28, 1 }
  0x4a   : > { %v275_v55 = vor.u32 %v274_v48, %v273_v46  ;;  %v278_v61 = vor.u32 %v277_v53, %v276_v51  ;;  %v281_v63 = vor.u32 %v280_v57, %v279_v56  ;;  %v1546_v1 = vor.u32 %v438_v43, %v437_v54 }
  0x4b   : > { %v297_v58 = vsel %vm291_vm2, %v284_v49, 920167782  ;;  %v301_v59 = vsel %vm291_vm2, %v287_v50, 1326507024  ;;  %v442_v2 = vor.u32 %v441_v44, %v440_v60  ;;  %vm290_vm4 = vcmp.lt.s32.totalorder %v1515_v28, 3 }
  0x4c   : > { %v296_v3 = vsel %vm288_vm3, %v275_v55, %v278_v61  ;;  %vm289_vm5 = vcmp.lt.s32.totalorder %v1515_v28, 2  ;;  %v298_v4 = vsel %vm290_vm4, %v281_v63, %v297_v58  ;;  %v300_v5 = vsel %vm288_vm3, %v278_v61, %v281_v63 }
  0x4d   : > { %v302_v6 = vsel %vm290_vm4, %v284_v49, %v301_v59  ;;  %v272_v9 = vshrl.u32 %v1348_v45, %v271_v31  ;;  %v293_v10 = vsel %vm291_vm2, %v281_v63, 2102212464  ;;  %v299_v12 = vsel %vm289_vm5, %v296_v3, %v298_v4 }
  0x4e   : > { %v303_v13 = vsel %vm289_vm5, %v300_v5, %v302_v6  ;;  %vm446_vm6 = vcmp.lt.s32.totalorder %v1541_v62, 4  ;;  %v329_v16 = vand.u32 65535, %v299_v12  ;;  %v330_v23 = vshrl.u32 %v299_v12, 16 }
  0x4f   : > { %v307_v14 = vand.u32 65535, %v303_v13  ;;  %v308_v15 = vshrl.u32 %v303_v13, 16  ;;  %v452_v17 = vsel %vm446_vm6, %v1546_v1, 920167782  ;;  %v456_v18 = vsel %vm446_vm6, %v442_v2, 1326507024 }
  0x50   : > { %v292_v22 = vsel %vm288_vm3, %v272_v9, %v275_v55  ;;  %v294_v24 = vsel %vm290_vm4, %v278_v61, %v293_v10  ;;  %v428_v29 = vshll.u32 %v1348_v45, %v1517_v30  ;;  %v332_v31 = vmul.u32 %v330_v23, %v305_v36 }
  0x51   : > { %v310_v25 = vmul.u32 %v308_v15, %v305_v36  ;;  %v311_v26 = vmul.u32 %v307_v14, %v1525_v37  ;;  %v333_v32 = vmul.u32 %v329_v16, %v1525_v37  ;;  %v429_v34 = vshrl.u32 %v1349_v47, %v1521_v35 }
  0x52   : > { %v431_v38 = vshll.u32 %v1349_v47, %v1517_v30  ;;  %v309_v39 = vmul.u32 %v307_v14, %v305_v36  ;;  %v312_v40 = vmul.u32 %v308_v15, %v1525_v37  ;;  %v331_v42 = vmul.u32 %v329_v16, %v305_v36 }
  0x53   : > { %v313_v41 = vshll.u32 %v310_v25, 16  ;;  %v314_v43 = vshrl.u32 %v310_v25, 16  ;;  %v315_v44 = vshll.u32 %v311_v26, 16  ;;  %v334_v46 = vmul.u32 %v330_v23, %v1525_v37 }
  0x54   : > { %v335_v48 = vshll.u32 %v332_v31, 16  ;;  %v337_v50 = vshll.u32 %v333_v32, 16  ;;  %v432_v51 = vshrl.u32 %v1350_v52, %v1521_v35  ;;  %v1351_v53 = vmov 0  }
  0x55   : > { %vm317_vm7 = vc.u32 %v309_v39, %v313_v41  ;;  %v319_v49 = vadd.s32 %v313_v41, %v309_v39  ;;  %v1586_v55 = vor.u32 %v429_v34, %v428_v29  ;;  %v316_v37 = vshrl.u32 %v311_v26, 16 }
  0x56   : > { %v318_v54 = vsel %vm317_vm7, 1, %v1351_v53  ;;  %vm339_vm8 = vc.u32 %v331_v42, %v335_v48  ;;  %v341_v47 = vadd.s32 %v335_v48, %v331_v42  ;;  %v1589_v57 = vor.u32 %v432_v51, %v431_v38 }
  0x57   : > { %v320_v56 = vadd.s32 %v318_v54, %v312_v40  ;;  %vm321_vm9 = vc.u32 %v319_v49, %v315_v44  ;;  %v340_v36 = vsel %vm339_vm8, 1, %v1351_v53  ;;  %v434_v63 = vshll.u32 %v1350_v52, %v1517_v30 }
  0x58   : > { %v322_v58 = vsel %vm321_vm9, 1, %v1351_v53  ;;  %v342_v59 = vadd.s32 %v340_v36, %v334_v46  ;;  %vm343_vm10 = vc.u32 %v341_v47, %v337_v50  ;;  %v435_v2 = vshrl.u32 %v1345_v33, %v1521_v35 }
  0x59   : > { %v324_v60 = vadd.s32 %v322_v58, %v320_v56  ;;  %v344_v61 = vsel %vm343_vm10, 1, %v1351_v53  ;;  %v336_v3 = vshrl.u32 %v332_v31, 16  ;;  %vm443_vm11 = vcmp.lt.s32.totalorder %v1541_v62, 1 }
  0x5a   : > { %v346_v4 = vadd.s32 %v344_v61, %v342_v59  ;;  %vm445_vm12 = vcmp.lt.s32.totalorder %v1541_v62, 3  ;;  %v436_v6 = vor.u32 %v435_v2, %v434_v63  ;;  %v451_v9 = vsel %vm443_vm11, %v1586_v55, %v1589_v57 }
  0x5b   : > { %v325_v5 = vadd.s32 %v324_v60, %v314_v43  ;;  %v457_v30 = vsel %vm445_vm12, %v1546_v1, %v456_v18  ;;  %v338_v52 = vshrl.u32 %v333_v32, 16  ;;  %v1606_v10 = vadd.s32 %v341_v47, %v337_v50 }
  0x5c   : > { %v347_v33 = vadd.s32 %v346_v4, %v336_v3  ;;  %vm444_vm13 = vcmp.lt.s32.totalorder %v1541_v62, 2  ;;  %v453_v13 = vsel %vm445_vm12, %v436_v6, %v452_v17  ;;  %v455_v14 = vsel %vm443_vm11, %v1589_v57, %v436_v6 }
  0x5d   : > { %v1608_v12 = vadd.s32 %v325_v5, %v316_v37  ;;  %v295_v15 = vsel %vm289_vm5, %v292_v22, %v294_v24  ;;  %v454_v1 = vsel %vm444_vm13, %v451_v9, %v453_v13  ;;  %v458_v18 = vsel %vm444_vm13, %v455_v14, %v457_v30 }
  0x5e   : > { %v348_v16 = vadd.s32 %v347_v33, %v338_v52  ;;  %v460_v23 = vand.u32 65535, %v1544_v0  ;;  %v461_v17 = vshrl.u32 %v1544_v0, 16  ;;  %v462_v25 = vand.u32 65535, %v458_v18 }
  0x5f   : > { %vm351_vm14 = vc.u32 %v1608_v12, %v1606_v10  ;;  %v463_v29 = vshrl.u32 %v458_v18, 16  ;;  %v484_v31 = vand.u32 65535, %v454_v1  ;;  %v485_v28 = vshrl.u32 %v454_v1, 16 }
  0x60   : > { %v352_v26 = vadd.s32 1, %v348_v16  ;;  %v349_v22 = vmul.u32 %v1513_v27, %v295_v15  ;;  %v466_v34 = vmul.u32 %v462_v25, %v461_v17  ;;  %v464_v40 = vmul.u32 %v462_v25, %v460_v23 }
  0x61   : > { %v465_v32 = vmul.u32 %v463_v29, %v460_v23  ;;  %v487_v39 = vmul.u32 %v485_v28, %v460_v23  ;;  %v488_v42 = vmul.u32 %v484_v31, %v461_v17  ;;  %v467_v44 = vmul.u32 %v463_v29, %v461_v17 }
  0x62   : > { %v353_v24 = vsel %vm351_vm14, %v352_v26, %v348_v16  ;;  %v486_v46 = vmul.u32 %v484_v31, %v460_v23  ;;  %v470_v49 = vshll.u32 %v466_v34, 16  ;;  %v489_v51 = vmul.u32 %v485_v28, %v461_v17 }
  0x63   : > { %v354_v38 = vadd.s32 %v353_v24, %v349_v22  ;;  %v468_v41 = vshll.u32 %v465_v32, 16  ;;  %v490_v48 = vshll.u32 %v487_v39, 16  ;;  %v492_v36 = vshll.u32 %v488_v42, 16 }
  0x64   : > { %v448_v61 = vsel %vm446_vm6, %v436_v6, 2102212464  ;;  %v469_v63 = vshrl.u32 %v465_v32, 16  ;;  %v427_v4 = vshrl.u32 %v1348_v45, %v1521_v35  ;;  %v471_v9 = vshrl.u32 %v466_v34, 16 }
  0x65   : > { %v355_v43 = vadd.s32 536870912, %v354_v38  ;;  %vm472_vm15 = vc.u32 %v464_v40, %v468_v41  ;;  %v474_v50 = vadd.s32 %v468_v41, %v464_v40  ;;  %vm494_vm0 = vc.u32 %v486_v46, %v490_v48 }
  0x66   : > { %v473_v27 = vsel %vm472_vm15, 1, %v1351_v53  ;;  %v496_v47 = vadd.s32 %v490_v48, %v486_v46  ;;  %v495_v37 = vsel %vm494_vm0, 1, %v1351_v53  ;;  %v491_v52 = vshrl.u32 %v487_v39, 16 }
  0x67   : > { %v1627_v54 = vshrl.u32 %v355_v43, 30  ;;  %v475_v56 = vadd.s32 %v473_v27, %v467_v44  ;;  %vm476_vm1 = vc.u32 %v474_v50, %v470_v49  ;;  %v497_v60 = vadd.s32 %v495_v37, %v489_v51 }
  0x68   : > { %v477_v59 = vsel %vm476_vm1, 1, %v1351_v53  ;;  %vm498_vm2 = vc.u32 %v496_v47, %v492_v36  ;;  %v447_v14 = vsel %vm443_vm11, %v427_v4, %v1586_v55  ;;  %v449_v6 = vsel %vm445_vm12, %v1589_v57, %v448_v61 }
  0x69   : > { %v357_v58 = vshll.u32 %v1627_v54, 30  ;;  %v479_v2 = vadd.s32 %v477_v59, %v475_v56  ;;  %v499_v5 = vsel %vm498_vm2, 1, %v1351_v53  ;;  %v493_v16 = vshrl.u32 %v488_v42, 16 }
  0x6a   : > { %v501_v33 = vadd.s32 %v499_v5, %v497_v60  ;;  %v500_v45 = vadd.s32 %v496_v47, %v492_v36  ;;  %v450_v18 = vsel %vm444_vm13, %v447_v14, %v449_v6  ;;  %v350_v57 = vadd.s32 %v1606_v10, %v1608_v12 }
  0x6b   : > { %v358_v3 = vsub.s32 %v354_v38, %v357_v58  ;;  %v480_v30 = vadd.s32 %v479_v2, %v469_v63  ;;  %v504_v26 = vmul.u32 %v1544_v0, %v450_v18  ;;  %vm258_vm7 = vcmp.lt.s32.totalorder %v1497_v7, 0 }
  0x6c   : > { %v502_v1 = vadd.s32 %v501_v33, %v491_v52  ;;  %vm1652_vm8 = vcmp.le.f32.partialorder %v256_v11, 0.7853982  ;;  %v380_v14 = vsub.s32 4, %v1627_v54  ;;  %vm1664_vm10 = vcmp.le.f32.partialorder %v411_v19, 0.7853982 }
  0x6d   : > { %vm359_vm3 = vcmp.lt.s32.totalorder %v358_v3, 0  ;;  %v360_v13 = vsub.s32 0, %v358_v3  ;;  %v481_v15 = vadd.s32 %v480_v30, %v471_v9  ;;  %vm413_vm11 = vcmp.lt.s32.totalorder %v1499_v8, 0 }
  0x6e   : > { %v503_v23 = vadd.s32 %v502_v1, %v493_v16 }
  0x6f   : > { %v361_v35 = vsel %vm359_vm3, %v360_v13, %v358_v3  ;;  %vm506_vm4 = vc.u32 %v481_v15, %v500_v45  ;;  %v505_v58 = vadd.s32 %v500_v45, %v481_v15  ;;  %v381_v45 = vsel %vm258_vm7, %v380_v14, %v1627_v54 }
  0x70   : > { %v362_v53 = vclz %v361_v35  ;;  %v507_v25 = vadd.s32 1, %v503_v23  ;;  %v383_v19 = vsel %vm1652_vm8, 0, %v381_v45 }
  0x71   : > { %v400_v54 = vadd.s32 3, %v383_v19 }
  0x72   : > { %v1045_v17 = vadd.s32 4294967294, %v362_v53  ;;  %v508_v55 = vsel %vm506_vm4, %v507_v25, %v503_v23 }
  0x73   : > { %v509_v31 = vadd.s32 %v508_v55, %v504_v26 }
  0x74   : > { %vm1046_vm5 = vcmp.lt.s32.totalorder %v1045_v17, 0 }
  0x75   : > { %v365_v29 = vsel %vm1046_vm5, 0, %v1045_v17  ;;  %v510_v24 = vadd.s32 536870912, %v509_v31 }
  0x76   : > { %v366_v28 = vsub.s32 32, %v365_v29  ;;  %v370_v22 = vsub.s32 4294967266, %v365_v29  ;;  %v367_v32 = vshll.u32 %v358_v3, %v365_v29 }
  0x77   : > { %v511_v38 = vshrl.u32 %v510_v24, 30 }
  0x78   : > { %v368_v34 = vshrl.u32 %v350_v57, %v366_v28  ;;  %v371_v62 = vadd.s32 127, %v370_v22 }
  0x79   : > { %v512_v41 = vshll.u32 %v511_v38, 30  ;;  %v535_v23 = vsub.s32 4, %v511_v38 }
  0x7a   : > { %v369_v39 = vor.u32 %v368_v34, %v367_v32  ;;  %v372_v40 = vshll.u32 %v371_v62, 23 }
  0x7b   : > { %v513_v43 = vsub.s32 %v509_v31, %v512_v41  ;;  %v536_v29 = vsel %vm413_vm11, %v535_v23, %v511_v38 }
  0x7c   : > { %v373_v42 = vor.u32 4788187, %v372_v40  ;;  %v376_v44 = vcvt.s32.f32 %v369_v39  ;;  %v538_v32 = vsel %vm1664_vm10, 0, %v536_v29  ;;  %v726_v40 = vand.u32 3, %v383_v19 }
  0x7d   : > { %vm514_vm6 = vcmp.lt.s32.totalorder %v513_v43, 0  ;;  %v515_v46 = vsub.s32 0, %v513_v43 }
  0x7e   : > { %v374_v0 = vand.u32 2147483647, %v373_v42  ;;  %vm727_vm12 = vcmp.lt.s32.totalorder %v726_v40, 2  ;;  %vm728_vm0 = vcmp.eq.s32.totalorder %v726_v40, 0  ;;  %vm731_vm1 = vcmp.eq.s32.totalorder %v726_v40, 2 }
  0x7f   : > { %v516_v49 = vsel %vm514_vm6, %v515_v46, %v513_v43 }
  0x80   : > { %v377_v48 = vmul.f32 %v376_v44, %v374_v0  ;;  %v517_v10 = vclz %v516_v49  ;;  %v555_v0 = vadd.s32 3, %v538_v32  ;;  %v401_v44 = vand.u32 3, %v400_v54 }
  0x81   : > { %v880_v49 = vand.u32 3, %v538_v32 }
  0x82   : > { %v378_v50 = vxor.u32 2147483648, %v377_v48  ;;  %v1048_v27 = vadd.s32 4294967294, %v517_v10  ;;  %vm402_vm13 = vcmp.lt.s32.totalorder %v401_v44, 2  ;;  %vm403_vm14 = vcmp.eq.s32.totalorder %v401_v44, 0 }
  0x83   : > { %vm406_vm15 = vcmp.eq.s32.totalorder %v401_v44, 2  ;;  %vm881_vm2 = vcmp.lt.s32.totalorder %v880_v49, 2  ;;  %vm882_vm3 = vcmp.eq.s32.totalorder %v880_v49, 0  ;;  %vm885_vm4 = vcmp.eq.s32.totalorder %v880_v49, 2 }
  0x84   : > { %v379_v51 = vsel %vm258_vm7, %v378_v50, %v377_v48  ;;  %vm1049_vm9 = vcmp.lt.s32.totalorder %v1048_v27, 0 }
  0x85   : > { %v382_v47 = vsel %vm1652_vm8, %v1497_v7, %v379_v51  ;;  %v520_v36 = vsel %vm1049_vm9, 0, %v1048_v27  ;;  %v556_v51 = vand.u32 3, %v555_v0  ;;  %vm399_vm8 = vweird.f32 %v1497_v7 }
  0x86   : > { %v384_v56 = vmul.f32 %v382_v47, %v382_v47  ;;  %v521_v59 = vsub.s32 32, %v520_v36  ;;  %v525_v60 = vsub.s32 4294967266, %v520_v36  ;;  %v522_v63 = vshll.u32 %v513_v43, %v520_v36 }
  0x87   : > { %vm557_vm5 = vcmp.lt.s32.totalorder %v556_v51, 2  ;;  %vm558_vm6 = vcmp.eq.s32.totalorder %v556_v51, 0  ;;  %vm561_vm7 = vcmp.eq.s32.totalorder %v556_v51, 2  ;;  %vm554_vm9 = vweird.f32 %v1499_v8 }
  0x88   : > { %v392_v37 = vmul.f32 -0.00019511016, %v384_v56  ;;  %v523_v61 = vshrl.u32 %v505_v58, %v521_v59  ;;  %v526_v2 = vadd.s32 127, %v525_v60  ;;  %v385_v3 = vmul.f32 -0.001358992, %v384_v56 }
  0x8a   : > { %v393_v11 = vadd.f32 0.008332121, %v392_v37  ;;  %v524_v4 = vor.u32 %v523_v61, %v522_v63  ;;  %v527_v5 = vshll.u32 %v526_v2, 23  ;;  %v386_v52 = vadd.f32 0.041655596, %v385_v3 }
  0x8c   : > { %v394_v9 = vmul.f32 %v393_v11, %v384_v56  ;;  %v528_v30 = vor.u32 4788187, %v527_v5  ;;  %v531_v13 = vcvt.s32.f32 %v524_v4  ;;  %v387_v1 = vmul.f32 %v386_v52, %v384_v56  ;;  %v895_v4 = vld.sshfl [vmem:[#allocation1 + $0x8] sm:$0xff pattern:$0x73625140] }
  0x8e   : > { %v529_v33 = vand.u32 2147483647, %v528_v30  ;;  %v395_v6 = vadd.f32 -0.16666654, %v394_v9  ;;  %v388_v25 = vadd.f32 -0.4999988, %v387_v1 }
  0x8f   : > { %v894_v30 = vld.sshfl [vmem:[#allocation1] sm:$0xff pattern:$0x73625140] }
  0x90   : > { %v532_v16 = vmul.f32 %v531_v13, %v529_v33  ;;  %v396_v53 = vmul.f32 %v395_v6, %v384_v56  ;;  %v389_v28 = vmul.f32 %v388_v25, %v384_v56 }
  0x92   : > { %v533_v15 = vxor.u32 2147483648, %v532_v16  ;;  %v397_v55 = vadd.f32 1.0, %v396_v53  ;;  %v390_v41 = vadd.f32 1.0, %v389_v28 }
  0x94   : > { %v534_v18 = vsel %vm413_vm11, %v533_v15, %v532_v16  ;;  %v398_v34 = vmul.f32 %v397_v55, %v382_v47  ;;  %v407_v50 = vxor.u32 2147483648, %v390_v41 }
  0x95   : > { %v537_v17 = vsel %vm1664_vm10, %v1499_v8, %v534_v18  ;;  %vm578_vm10 = vcmask 1041408  }
  0x96   : > { %v539_v26 = vmul.f32 %v537_v17, %v537_v17  ;;  %v404_v46 = vxor.u32 2147483648, %v398_v34  ;;  %v408_v37 = vsel %vm406_vm15, %v407_v50, %v398_v34  ;;  %v733_v59 = vsel %vm731_vm1, %v407_v50, %v398_v34 }
  0x98   : > { %v540_v31 = vmul.f32 -0.001358992, %v539_v26  ;;  %v547_v57 = vmul.f32 -0.00019511016, %v539_v26  ;;  %v405_v27 = vsel %vm403_vm14, %v390_v41, %v404_v46  ;;  %v730_v36 = vsel %vm728_vm0, %v390_v41, %v404_v46 }
  0x99   : > { %v409_v60 = vsel %vm402_vm13, %v405_v27, %v408_v37  ;;  %v734_v61 = vsel %vm727_vm12, %v730_v36, %v733_v59 }
  0x9a   : > { %v541_v22 = vadd.f32 0.041655596, %v540_v31  ;;  %v548_v24 = vadd.f32 0.008332121, %v547_v57  ;;  %v410_v52 = vsel %vm399_vm8, nan, %v409_v60  ;;  %v735_v13 = vsel %vm399_vm8, nan, %v734_v61 }
  0x9b   : > { %v573_v7 = vmul.f32 %v1507_v20, %v410_v52  ;;  %v898_v1 = vmul.f32 %v894_v30, %v735_v13 }
  0x9c   : > { %v542_v62 = vmul.f32 %v541_v22, %v539_v26  ;;  %v549_v39 = vmul.f32 %v548_v24, %v539_v26 }
  0x9e   : > { %v543_v42 = vadd.f32 -0.4999988, %v542_v62  ;;  %v550_v43 = vadd.f32 -0.16666654, %v549_v39 }
  0xa0   : > { %v544_v38 = vmul.f32 %v543_v42, %v539_v26  ;;  %v551_v48 = vmul.f32 %v550_v43, %v539_v26 }
  0xa2   : > { %v545_v10 = vadd.f32 1.0, %v544_v38  ;;  %v552_v12 = vadd.f32 1.0, %v551_v48 }
  0xa4   : > { %v553_v47 = vmul.f32 %v552_v12, %v537_v17  ;;  %v562_v56 = vxor.u32 2147483648, %v545_v10 }
  0xa6   : > { %v559_v58 = vxor.u32 2147483648, %v553_v47  ;;  %v563_v63 = vsel %vm561_vm7, %v562_v56, %v553_v47  ;;  %v887_v3 = vsel %vm885_vm4, %v562_v56, %v553_v47 }
  0xa8   : > { %v560_v11 = vsel %vm558_vm6, %v545_v10, %v559_v58  ;;  %v884_v2 = vsel %vm882_vm3, %v545_v10, %v559_v58 }
  0xa9   : > { %v564_v5 = vsel %vm557_vm5, %v560_v11, %v563_v63  ;;  %v888_v9 = vsel %vm881_vm2, %v884_v2, %v887_v3 }
  0xaa   : > { %v565_v33 = vsel %vm554_vm9, nan, %v564_v5  ;;  %v889_v14 = vsel %vm554_vm9, nan, %v888_v9 }
  0xab   : > { %v574_v6 = vmul.f32 %v1509_v21, %v565_v33  ;;  %v899_v16 = vmul.f32 %v895_v4, %v889_v14 }
  0xad   : > { %v577_v8 = vrot.slane %v574_v6, 6  ;;  %v902_v15 = vrot.slane %v899_v16, 6 }
  0xaf   : > { %v579_v35 = vsel %vm578_vm10, %v573_v7, %v577_v8  ;;  %v903_v45 = vsel %vm578_vm10, %v898_v1, %v902_v15 }
  0xb0   : > { %581 = vst [vmem:[%s238_s26] sm:$0xf] %v579_v35 }
  0xb1   : > { %1057 = vst [vmem:[%s238_s26 + $0x4] sm:$0xf] %v903_v45 }
  0xb2   : > { %1276 = shalt.err (!%p1273_p1)
}
  0xb3   : > { %s1352_s20 = smov 64   ;;  %s1353_s28 = smov 4  }
  0xb4   : > { %1075 = dma.vmem_to_hbm [thread:$0]  (%p1426_p8), %s923_s21, 128, %s925_s29, %s908_s4, %s1352_s20, %s1352_s20, %s1353_s28  }
  0xb5 PF: > { %s939_s7 = sand.u32 1, %s1319_s12   ;;  %p1089_p2 = pnand %p1035_p13, %p1430_p9 }
  0xb6   : > { %s940_s10 = scalar_lea.sflag [#allocation4], %s939_s7 }
  0xb7   : > { %p1090_p4 = pneg %p1089_p2 }
  0xb9   : > { %1314 = dma.done.wait (%p1090_p4), %s940_s10, 128  }
  0xba   : > { %1316 = vsyncadd (%p1090_p4), %s940_s10, 4294967168  ;;  %s18_s17 = sadd.s32 1, %s1339_s17   ;;  %s1742_s12 = smov %s1323_s13 }
  0xbb   : > { %p15_p6 = scmp.ge.s32.totalorder %s18_s17, 4   ;;  %s1743_s13 = smov %s1327_s14 }
  0xbc   : > { %s1744_s14 = smov %s1472_s8  ;;  %s1745_s15 = smov %s1335_s16 }
  0xbd   : > { %s1746_s16 = smov %s1748_s11  ;;  %17 = sbr.rel (!%p15_p6) target bundleno = 8 (0x8), region = 87 }
  0xc2   :  { %946 = vsyncpa [#allocation3], 1 }
  0xc3   :  { %948 = vsyncpa [#allocation3 + $0x1], 1 }
  0xc4   :  { %949 = vsyncpa [#allocation6], 1 }
  0xc5   :  { %950 = vsyncpa [#allocation4], 1 }
  0xc6   :  { %952 = vsyncpa [#allocation4 + $0x1], 1 }

</bundles_post_ra>
